<compile_context>
chip_gen: v5e
topology: v5e:2x2
jax: 0.10.0
libtpu: 0.0.40
codegen_flags: <defaults>
</compile_context>

<pallas_src>
import jax
import jax.numpy as jnp
from jax.experimental import pallas as pl
from jax.experimental.pallas import tpu as pltpu

EPS = 1e-5
NUM_HEADS = 12
INTER_DIM = 64
FUSED_OUT = 128          # lane-dense padded width of the fused output
VMEM_LIMIT = 32 * 1024 * 1024


def _round_up(x, m):
    return (x + m - 1) // m * m


def _choose_tile(B, batch_tile):
    """Batch tile: <= batch_tile rows, multiple of 8, and (when B allows)
    small enough that the grid has >= 2 steps for the v7x TensorCore split."""
    TB = min(batch_tile, _round_up(B, 8))
    if B > 8:
        half = max(8, _round_up((B + 1) // 2, 8))
        TB = min(TB, half)
    return TB


# --------------------------------------------------------------------------
# Kernel 1: BatchNorm batch statistics.  Each grid step writes its own
# (1, 2, D) block of per-tile partial sums (row 0 = sum, row 1 = sum of
# squares); the axis is "parallel" so both v7x TensorCores share the
# reduction pass.  Final (num_tiles -> 1) reduction is a tiny wrapper op.
# --------------------------------------------------------------------------
def bn_stats_kernel(x_ref, stats_ref):
    x = x_ref[...]                                               # (TB, D)
    stats_ref[:, 0:1, :] = jnp.sum(x, axis=0, keepdims=True)[None]
    stats_ref[:, 1:2, :] = jnp.sum(x * x, axis=0, keepdims=True)[None]


# --------------------------------------------------------------------------
# Kernel 2: the whole forward is one GEMM per batch tile.
#   out = emb @ W_fold + b_fold
# where W_fold already contains BN scale * (head projections @ fused
# second stage) and b_fold contains BN shift, head biases, and AU_inter bias.
# Output is lane-dense 128 wide: cols [0,12)=AU logits, [12,76)=inter.
# --------------------------------------------------------------------------
def au_multihead_kernel(emb_ref, w_ref, b_ref, out_ref):
    out_ref[...] = jnp.dot(emb_ref[...], w_ref[...],
                           preferred_element_type=jnp.float32) + b_ref[...]


# --------------------------------------------------------------------------
# One-time parameter packing (keep OUT of the per-call path).
# --------------------------------------------------------------------------
def pack_params(params):
    gamma = params["gamma"]
    D = gamma.shape[0]
    E = params["wp"][0].shape[0]
    HE = NUM_HEADS * E

    # 12 head projections, each (E, D) -> one (D, HE) matrix + (HE,) bias.
    wp_cat = jnp.concatenate([w.T for w in params["wp"]], axis=1)        # (D, HE)
    bp_cat = jnp.concatenate(params["bp"], axis=0)                       # (HE,)

    # Fused second stage: block-diagonal "last" weights (HE, 12) alongside
    # the AU_inter weight (HE, 64), padded to a lane-dense 128-wide output.
    wl_stack = jnp.stack([w.reshape(E) for w in params["wl"]], axis=0)   # (12, E)
    eye = jnp.eye(NUM_HEADS, dtype=jnp.float32)
    wl_bd = (wl_stack[:, :, None] * eye[:, None, :]).reshape(HE, NUM_HEADS)
    w2 = jnp.zeros((HE, FUSED_OUT), jnp.float32)
    w2 = w2.at[:, :NUM_HEADS].set(wl_bd)
    w2 = w2.at[:, NUM_HEADS:NUM_HEADS + INTER_DIM].set(params["wi"].T)
    b2 = jnp.zeros((FUSED_OUT,), jnp.float32)
    b2 = b2.at[NUM_HEADS:NUM_HEADS + INTER_DIM].set(params["bi"])

    # Collapse the two chained GEMMs (the 12*E intermediate is never output).
    w_eff = wp_cat @ w2                                   # (D, 128)
    b_eff = (bp_cat @ w2 + b2).reshape(1, FUSED_OUT)      # (1, 128)

    return {
        "gamma": gamma.reshape(1, D).astype(jnp.float32),
        "beta": params["beta"].reshape(1, D).astype(jnp.float32),
        "w_eff": w_eff.astype(jnp.float32),
        "b_eff": b_eff.astype(jnp.float32),
    }


# --------------------------------------------------------------------------
# Forward wrapper.
# --------------------------------------------------------------------------
def au_multihead_forward(emb, packed, *, batch_tile=2048):
    """emb: (B, D) float32. Returns (AU_out (B,12,1), AU_inter_out (B,64))."""
    B, D = emb.shape
    TB = _choose_tile(B, batch_tile)
    Bp = _round_up(B, TB)
    emb_p = emb if Bp == B else jnp.zeros((Bp, D), emb.dtype).at[:B].set(emb)
    num_tiles = Bp // TB

    # Pass 1: per-tile partial batch statistics (padded rows are zero, so the
    # sums are exact; we divide by the real B below).
    partials = pl.pallas_call(
        bn_stats_kernel,
        out_shape=jax.ShapeDtypeStruct((num_tiles, 2, D), jnp.float32),
        grid=(num_tiles,),
        in_specs=[pl.BlockSpec((TB, D), lambda i: (i, 0))],
        out_specs=pl.BlockSpec((1, 2, D), lambda i: (i, 0, 0)),
        compiler_params=pltpu.CompilerParams(
            dimension_semantics=("parallel",),
            vmem_limit_bytes=VMEM_LIMIT),
    )(emb_p)
    stats = jnp.sum(partials, axis=0)                       # (2, D)

    mean = stats[0:1] / B
    var = jnp.maximum(stats[1:2] / B - mean * mean, 0.0)    # biased, clamped
    scale = packed["gamma"] * jax.lax.rsqrt(var + EPS)      # (1, D)
    shift = packed["beta"] - mean * scale                   # (1, D)

    # Fold the per-batch BN affine into the (tiny) fused weight/bias so the
    # kernel body is a single pure GEMM.
    w_fold = scale.reshape(D, 1) * packed["w_eff"]          # (D, 128)
    b_fold = shift @ packed["w_eff"] + packed["b_eff"]      # (1, 128)

    # Pass 2: one pipelined GEMM per batch tile (axis "parallel" so the two
    # v7x TensorCores split it; no-op on v5e/v6e).
    fused = pl.pallas_call(
        au_multihead_kernel,
        out_shape=jax.ShapeDtypeStruct((Bp, FUSED_OUT), jnp.float32),
        grid=(num_tiles,),
        in_specs=[
            pl.BlockSpec((TB, D), lambda i: (i, 0)),              # emb tile
            pl.BlockSpec((D, FUSED_OUT), lambda i: (0, 0)),       # W_fold
            pl.BlockSpec((1, FUSED_OUT), lambda i: (0, 0)),       # b_fold
        ],
        out_specs=pl.BlockSpec((TB, FUSED_OUT), lambda i: (i, 0)),
        compiler_params=pltpu.CompilerParams(
            dimension_semantics=("parallel",),
            vmem_limit_bytes=VMEM_LIMIT),
    )(emb_p, w_fold, b_fold)

    au_out = fused[:B, :NUM_HEADS][:, :, None]                # (B, 12, 1)
    inter_out = fused[:B, NUM_HEADS:NUM_HEADS + INTER_DIM]    # (B, 64)
    return au_out, inter_out


# --------------------------------------------------------------------------
# Parameter construction + pure-JAX reference (mirrors the PyTorch module).
# --------------------------------------------------------------------------
def make_params(key, input_dim, emb_dim):
    H = NUM_HEADS
    keys = jax.random.split(key, 4 * H + 4)
    k = iter(keys)
    bound_p = 1.0 / jnp.sqrt(input_dim)
    bound_l = 1.0 / jnp.sqrt(emb_dim)
    bound_i = 1.0 / jnp.sqrt(emb_dim * H)
    return {
        "gamma": jnp.ones((input_dim,), jnp.float32),
        "beta": jnp.zeros((input_dim,), jnp.float32),
        "wp": [jax.random.uniform(next(k), (emb_dim, input_dim), jnp.float32,
                                  -bound_p, bound_p) for _ in range(H)],
        "bp": [jax.random.uniform(next(k), (emb_dim,), jnp.float32,
                                  -bound_p, bound_p) for _ in range(H)],
        "wl": [jax.random.uniform(next(k), (1, emb_dim), jnp.float32,
                                  -bound_l, bound_l) for _ in range(H)],
        "wi": jax.random.uniform(next(k), (64, emb_dim * H), jnp.float32,
                                 -bound_i, bound_i),
        "bi": jax.random.uniform(next(k), (64,), jnp.float32, -bound_i, bound_i),
    }


def reference_forward(emb, params):
    """Pure-JAX reference mirroring the PyTorch forward (training-mode BN)."""
    mean = jnp.mean(emb, axis=0, keepdims=True)
    var = jnp.mean((emb - mean) ** 2, axis=0, keepdims=True)
    xn = (emb - mean) / jnp.sqrt(var + EPS) * params["gamma"] + params["beta"]
    xs, lasts = [], []
    for h in range(NUM_HEADS):
        xh = xn @ params["wp"][h].T + params["bp"][h]
        xs.append(xh)
        lasts.append((xh @ params["wl"][h].T)[:, None, :])    # (B,1,1)
    au_out = jnp.concatenate(lasts, axis=1)                   # (B,12,1)
    inter = jnp.concatenate(xs, axis=1)                       # (B,12*E)
    inter_out = inter @ params["wi"].T + params["bi"]         # (B,64)
    return au_out, inter_out


if __name__ == "__main__":
    B, D, E = 8, 128, 16   # small shapes (module default input_dim=512, emb_dim=16)
    key = jax.random.PRNGKey(0)
    k_x, k_p, k_x2 = jax.random.split(key, 3)
    emb = jax.random.normal(k_x, (B, D), dtype=jnp.float32)
    params = make_params(k_p, D, E)
    packed = pack_params(params)                  # one-time packing

    fwd = jax.jit(au_multihead_forward)
    au_out, inter_out = fwd(emb, packed)
    jax.block_until_ready((au_out, inter_out))

    au_ref, inter_ref = reference_forward(emb, params)
    assert au_out.shape == (B, NUM_HEADS, 1) and inter_out.shape == (B, INTER_DIM)
    assert jnp.allclose(au_out, au_ref, atol=1e-4, rtol=1e-4)
    assert jnp.allclose(inter_out, inter_ref, atol=1e-4, rtol=1e-4)

    # Also exercise the padding / multi-tile path (B not a multiple of 8,
    # grid split into 2 steps).
    B2 = 10
    emb2 = jax.random.normal(k_x2, (B2, D), dtype=jnp.float32)
    au2, inter2 = fwd(emb2, packed)
    jax.block_until_ready((au2, inter2))
    au2_ref, inter2_ref = reference_forward(emb2, params)
    assert jnp.allclose(au2, au2_ref, atol=1e-4, rtol=1e-4)
    assert jnp.allclose(inter2, inter2_ref, atol=1e-4, rtol=1e-4)

    print("KERNEL_OK")
</pallas_src>

<mosaic_0001>
module attributes {stable_mosaic.version = 11 : i64} {
  func.func @au_multihead_kernel(%arg0: i32, %arg1: memref<8x128xf32, #tpu.memory_space<vmem>>, %arg2: memref<128x128xf32, #tpu.memory_space<vmem>>, %arg3: memref<1x128xf32, #tpu.memory_space<vmem>>, %arg4: memref<8x128xf32, #tpu.memory_space<vmem>>) attributes {dimension_semantics = [#tpu.dimension_semantics<parallel>], iteration_bounds = array<i64: 1>, scalar_prefetch = 0 : i64, scratch_operands = 0 : i64, tpu.core_type = #tpu.core_type<tc>, window_params = [{transform_indices = @transform_0, window_bounds = array<i64: 8, 128>}, {pipeline_mode = #tpu.pipeline_mode<synchronous>, transform_indices = @transform_1, window_bounds = array<i64: 128, 128>}, {pipeline_mode = #tpu.pipeline_mode<synchronous>, transform_indices = @transform_2, window_bounds = array<i64: 1, 128>}, {transform_indices = @transform_3, window_bounds = array<i64: 8, 128>}]} {
    %c0 = arith.constant 0 : index
    %c0_0 = arith.constant 0 : index
    %0 = vector.load %arg1[%c0, %c0_0] : memref<8x128xf32, #tpu.memory_space<vmem>>, vector<8x128xf32>
    %c0_1 = arith.constant 0 : index
    %c0_2 = arith.constant 0 : index
    %1 = vector.load %arg2[%c0_1, %c0_2] : memref<128x128xf32, #tpu.memory_space<vmem>>, vector<128x128xf32>
    %cst = arith.constant dense<0.000000e+00> : vector<8x128xf32>
    %2 = tpu.matmul %0, %1, %cst {dimension_numbers = #tpu.dot_dimension_numbers<[1], [0], [0], [1], [0, 0, 1, 1], [], []>} : vector<8x128xf32>, vector<128x128xf32>, vector<8x128xf32> -> vector<8x128xf32>
    %c0_3 = arith.constant 0 : index
    %c0_4 = arith.constant 0 : index
    %3 = vector.load %arg3[%c0_3, %c0_4] : memref<1x128xf32, #tpu.memory_space<vmem>>, vector<1x128xf32>
    %4 = vector.broadcast %3 : vector<1x128xf32> to vector<8x128xf32>
    %5 = arith.addf %2, %4 : vector<8x128xf32>
    %c0_5 = arith.constant 0 : index
    %c0_6 = arith.constant 0 : index
    %6 = vector.load %arg4[%c0_5, %c0_6] : memref<8x128xf32, #tpu.memory_space<vmem>>, vector<8x128xf32>
    tpu.vector_store %arg4[%c0_5, %c0_6], %5 {strides = array<i32>} : memref<8x128xf32, #tpu.memory_space<vmem>>, vector<8x128xf32>,
    return
  }
  func.func @transform_0(%arg0: i32) -> (i32, i32) {
    %c0_i32 = arith.constant 0 : i32
    %c0_i32_0 = arith.constant 0 : i32
    return %arg0, %c0_i32 : i32, i32
  }
  func.func @transform_1(%arg0: i32) -> (i32, i32) {
    %c0_i32 = arith.constant 0 : i32
    %c0_i32_0 = arith.constant 0 : i32
    %c0_i32_1 = arith.constant 0 : i32
    return %c0_i32, %c0_i32_0 : i32, i32
  }
  func.func @transform_2(%arg0: i32) -> (i32, i32) {
    %c0_i32 = arith.constant 0 : i32
    %c0_i32_0 = arith.constant 0 : i32
    %c0_i32_1 = arith.constant 0 : i32
    return %c0_i32, %c0_i32_0 : i32, i32
  }
  func.func @transform_3(%arg0: i32) -> (i32, i32) {
    %c0_i32 = arith.constant 0 : i32
    %c0_i32_0 = arith.constant 0 : i32
    return %arg0, %c0_i32 : i32, i32
  }
}

module attributes {stable_mosaic.version = 11 : i64} {
  func.func @bn_stats_kernel(%arg0: i32, %arg1: memref<8x128xf32, #tpu.memory_space<vmem>>, %arg2: memref<1x2x128xf32, #tpu.memory_space<vmem>>) attributes {dimension_semantics = [#tpu.dimension_semantics<parallel>], iteration_bounds = array<i64: 1>, scalar_prefetch = 0 : i64, scratch_operands = 0 : i64, tpu.core_type = #tpu.core_type<tc>, window_params = [{transform_indices = @transform_0, window_bounds = array<i64: 8, 128>}, {transform_indices = @transform_1, window_bounds = array<i64: 1, 2, 128>}]} {
    %c0 = arith.constant 0 : index
    %c0_0 = arith.constant 0 : index
    %0 = vector.load %arg1[%c0, %c0_0] : memref<8x128xf32, #tpu.memory_space<vmem>>, vector<8x128xf32>
    %cst = arith.constant dense<0.000000e+00> : vector<128xf32>
    %1 = vector.multi_reduction <add>, %0, %cst [0] : vector<8x128xf32> to vector<128xf32>
    %2 = vector.shape_cast %1 : vector<128xf32> to vector<1x128xf32>
    %3 = vector.shape_cast %2 : vector<1x128xf32> to vector<1x1x128xf32>
    %c0_1 = arith.constant 0 : index
    %c0_2 = arith.constant 0 : index
    %c0_3 = arith.constant 0 : index
    %4 = vector.load %arg2[%c0_1, %c0_2, %c0_3] : memref<1x2x128xf32, #tpu.memory_space<vmem>>, vector<1x1x128xf32>
    tpu.vector_store %arg2[%c0_1, %c0_2, %c0_3], %3 {strides = array<i32>} : memref<1x2x128xf32, #tpu.memory_space<vmem>>, vector<1x1x128xf32>,
    %5 = arith.mulf %0, %0 : vector<8x128xf32>
    %cst_4 = arith.constant dense<0.000000e+00> : vector<128xf32>
    %6 = vector.multi_reduction <add>, %5, %cst_4 [0] : vector<8x128xf32> to vector<128xf32>
    %7 = vector.shape_cast %6 : vector<128xf32> to vector<1x128xf32>
    %8 = vector.shape_cast %7 : vector<1x128xf32> to vector<1x1x128xf32>
    %c0_5 = arith.constant 0 : index
    %c1 = arith.constant 1 : index
    %c0_6 = arith.constant 0 : index
    %9 = vector.load %arg2[%c0_5, %c1, %c0_6] : memref<1x2x128xf32, #tpu.memory_space<vmem>>, vector<1x1x128xf32>
    tpu.vector_store %arg2[%c0_5, %c1, %c0_6], %8 {strides = array<i32>} : memref<1x2x128xf32, #tpu.memory_space<vmem>>, vector<1x1x128xf32>,
    return
  }
  func.func @transform_0(%arg0: i32) -> (i32, i32) {
    %c0_i32 = arith.constant 0 : i32
    %c0_i32_0 = arith.constant 0 : i32
    return %arg0, %c0_i32 : i32, i32
  }
  func.func @transform_1(%arg0: i32) -> (i32, i32, i32) {
    %c0_i32 = arith.constant 0 : i32
    %c0_i32_0 = arith.constant 0 : i32
    %c0_i32_1 = arith.constant 0 : i32
    return %arg0, %c0_i32, %c0_i32_0 : i32, i32, i32
  }
}

</mosaic_0001>

<bundles_post_ra>
// kernel: au_multihead_forward.3
= control target key start
LH: loop header
LB: loop body
LE: loop exit
PB: predicated region body
PF: predicated region fallthrough
CT: control target
= control target key end

     0   :  { %s138_s1 = inlined_call_operand.vmem [shape: f32[128,128], index: 1, kind: input, shape index: {}]   ;;  %s139_s2 = inlined_call_operand.vmem [shape: f32[1,128], index: 2, kind: input, shape index: {}]   ;;  %s140_s0 = inlined_call_operand.vmem [shape: f32[8,128], index: 0, kind: input, shape index: {}]   ;;  %s141_s3 = inlined_call_operand.vmem [shape: f32[8,128], index: 3, kind: output, shape index: {}]  }
   0x1   :  { %v30_v0 = vld [vmem:[%s138_s1 + $0x78] sm:$0xff]  ;;  %v29_v1 = vld [vmem:[%s138_s1 + $0x70] sm:$0xff]  ;;  %v28_v2 = vld [vmem:[%s138_s1 + $0x68] sm:$0xff] }
   0x2   :  { %35 = vmatpush.msra.mxu0 %v30_v0  ;;  %v27_v3 = vld [vmem:[%s138_s1 + $0x60] sm:$0xff]  ;;  %v26_v4 = vld [vmem:[%s138_s1 + $0x58] sm:$0xff]  ;;  %v25_v5 = vld [vmem:[%s138_s1 + $0x50] sm:$0xff] }
   0x3   :  { %v24_v6 = vld [vmem:[%s138_s1 + $0x48] sm:$0xff]  ;;  %v23_v7 = vld [vmem:[%s138_s1 + $0x40] sm:$0xff]  ;;  %v22_v8 = vld [vmem:[%s138_s1 + $0x38] sm:$0xff] }
   0x4   :  { %36 = vmatpush.msra.mxu0 %v29_v1  ;;  %v21_v9 = vld [vmem:[%s138_s1 + $0x30] sm:$0xff]  ;;  %v20_v10 = vld [vmem:[%s138_s1 + $0x28] sm:$0xff]  ;;  %v19_v11 = vld [vmem:[%s138_s1 + $0x20] sm:$0xff] }
   0x5   :  { %v18_v12 = vld [vmem:[%s138_s1 + $0x18] sm:$0xff]  ;;  %v17_v13 = vld [vmem:[%s138_s1 + $0x10] sm:$0xff]  ;;  %v16_v14 = vld [vmem:[%s138_s1 + $0x8] sm:$0xff] }
   0x6   :  { %37 = vmatpush.msra.mxu0 %v28_v2  ;;  %v15_v15 = vld [vmem:[%s138_s1] sm:$0xff] }
   0x7   :  { %v14_v16 = vld [vmem:[%s140_s0] sm:$0xff] }
   0x8   :  { %38 = vmatpush.msra.mxu0 %v27_v3  ;;  %v60_v17 = vld [vmem:[%s139_s2] ss:$0 sm:$0xff] }
   0xa   :  { %39 = vmatpush.msra.mxu0 %v26_v4 }
   0xc   :  { %40 = vmatpush.msra.mxu0 %v25_v5 }
   0xe   :  { %41 = vmatpush.msra.mxu0 %v24_v6 }
  0x10   :  { %42 = vmatpush.msra.mxu0 %v23_v7 }
  0x12   :  { %43 = vmatpush.msra.mxu0 %v22_v8 }
  0x14   :  { %44 = vmatpush.msra.mxu0 %v21_v9 }
  0x16   :  { %45 = vmatpush.msra.mxu0 %v20_v10 }
  0x18   :  { %46 = vmatpush.msra.mxu0 %v19_v11 }
  0x1a   :  { %47 = vmatpush.msra.mxu0 %v18_v12 }
  0x1c   :  { %48 = vmatpush.msra.mxu0 %v17_v13 }
  0x1e   :  { %49 = vmatpush.msra.mxu0 %v16_v14 }
  0x20   :  { %50 = vmatpush.msra.mxu0 %v15_v15 }
  0x21   :  { %51 = vmatmul.f32.vlgmr.msra.gmra.mxu0 %v14_v16 }
  0x9e   :  { %v52_v18 = vpop.f32.mrf.mxu0 }
  0x9f   :  { %v53_v19 = vadd.f32 %v60_v17, %v52_v18 }
  0xa1   :  { %55 = vst [vmem:[%s141_s3] sm:$0xff] %v53_v19 }

// kernel: au_multihead_forward.2
= control target key start
LH: loop header
LB: loop body
LE: loop exit
PB: predicated region body
PF: predicated region fallthrough
CT: control target
= control target key end

     0   :  { %6 = vsyncpa [#allocation3], 0  ;;  %s70_s9 = smov [#allocation2]   ;;  %s90_s0 = inlined_call_operand.hbm [shape: f32[8,128], index: 0, kind: input, shape index: {}]   ;;  %s91_s1 = inlined_call_operand.vmem [shape: f32[1,2,128], index: 1, kind: output, shape index: {}]  }
   0x1   :  { %s12_s8 = sshll.u32 %s90_s0, 4  ;;  %s14_s10 = sshll.u32 %s70_s9, 4  ;;  %s13_s8 = int_to_ptr.hbm [resolvable:$true] %s12_s8  ;;  %s15_s10 = int_to_ptr.vmem [resolvable:$true] %s14_s10 }
   0x2   :  { %17 = dma.hbm_to_vmem [thread:$0]  %s13_s8, 128, %s15_s10, [#allocation3]  }
   0x3   :  { %68 = dma.done.wait [#allocation3], 128  }
   0x4   :  { %69 = vsyncadd [#allocation3], 4294967168  ;;  %v22_v0 = vld [vmem:[#allocation2] sm:$0xff] }
   0x5   :  { %v23_v1 = vrot.slane %v22_v0, 4  ;;  %v30_v2 = vmul.f32 %v22_v0, %v22_v0 }
   0x7   :  { %v24_v3 = vadd.f32 %v23_v1, %v22_v0  ;;  %v31_v4 = vrot.slane %v30_v2, 4 }
   0x9   :  { %v25_v5 = vrot.slane %v24_v3, 2  ;;  %v32_v6 = vadd.f32 %v31_v4, %v30_v2 }
   0xb   :  { %v26_v7 = vadd.f32 %v25_v5, %v24_v3  ;;  %v33_v8 = vrot.slane %v32_v6, 2 }
   0xd   :  { %v27_v9 = vrot.slane %v26_v7, 1  ;;  %v34_v10 = vadd.f32 %v33_v8, %v32_v6 }
   0xf   :  { %v28_v11 = vadd.f32 %v27_v9, %v26_v7  ;;  %v35_v12 = vrot.slane %v34_v10, 1 }
  0x11   :  { %29 = vst [vmem:[%s91_s1] sm:$0x1] %v28_v11  ;;  %v36_v13 = vadd.f32 %v35_v12, %v34_v10 }
  0x13   :  { %37 = vst [vmem:[%s91_s1 + $0x1] sm:$0x1] %v36_v13 }
  0x14   :  { %42 = vsyncpa [#allocation3], 1 }

</bundles_post_ra>
